<compile_context>
chip_gen: v5e
topology: v5e:2x2
jax: 0.10.0
libtpu: 0.0.40
codegen_flags: <defaults>
</compile_context>

<pallas_src>
from functools import partial

import jax
import jax.numpy as jnp
from jax.experimental import pallas as pl
from jax.experimental.pallas import tpu as pltpu

NUM_QUBITS = 6
NUM_CLASS = 10


def classifier_kernel(re_ref, im_ref, m_ref, b_ref, out_ref):
    # re_ref/im_ref: (block_b, 2^n);  m_ref: (2^n, n_pad);
    # b_ref: (1, n_pad);  out_ref: (block_b, n_pad)
    re = re_ref[...]
    im = im_ref[...]
    probs = re * re + im * im                      # VPU; VALU has huge slack
    out_ref[...] = jnp.dot(probs, m_ref[...],
                           preferred_element_type=jnp.float32) + b_ref[...]


def _round_up(x, m):
    return (x + m - 1) // m * m


def build_classifier_params(weight, bias, num_qubits):
    """Precompute the folded measurement+linear matrix M = signs @ W^T and the
    padded bias.  Do this ONCE when weight/bias are static across calls."""
    dim = 2 ** num_qubits
    num_class = weight.shape[0]
    n_pad = max(_round_up(num_class, 8), 8)        # narrow, full-array-dim output

    # Z-sign matrix: signs[k, i] = +1 if bit i (MSB-first, torchquantum qubit
    # ordering) of basis index k is 0, else -1.
    k = jnp.arange(dim, dtype=jnp.int32)[:, None]                       # (2^n, 1)
    shift = (num_qubits - 1 - jnp.arange(num_qubits, dtype=jnp.int32))[None, :]
    signs = (1.0 - 2.0 * ((k >> shift) & 1)).astype(jnp.float32)        # (2^n, n)

    m = signs @ weight.T.astype(jnp.float32)                            # (2^n, C)
    m_pad = jnp.pad(m, ((0, 0), (0, n_pad - num_class)))                # (2^n, n_pad)
    b_pad = jnp.pad(bias.astype(jnp.float32),
                    (0, n_pad - num_class))[None, :]                    # (1, n_pad)
    return m_pad, b_pad


@partial(jax.jit, static_argnames=("num_class",))
def classifier_apply(psi_re, psi_im, m_pad, b_pad, num_class):
    """psi_re/psi_im: (B, 2**n) f32; m_pad: (2**n, n_pad); b_pad: (1, n_pad).
    Returns (B, num_class) f32."""
    B, dim = psi_re.shape
    n_pad = m_pad.shape[1]

    # Batch tiling: big blocks (multiple of 8 sublanes) to amortize per-step
    # overhead, but keep >= 2 parallel grid steps for non-trivial batches so
    # both v7x TensorCores participate.
    block_b = min(_round_up(B, 8), 2048)
    if B > 256:
        block_b = min(block_b, _round_up(pl.cdiv(B, 2), 8))
    grid = (pl.cdiv(B, block_b),)   # ragged last block handled by Pallas

    out = pl.pallas_call(
        classifier_kernel,
        out_shape=jax.ShapeDtypeStruct((B, n_pad), jnp.float32),
        grid=grid,
        in_specs=[
            pl.BlockSpec((block_b, dim), lambda i: (i, 0)),
            pl.BlockSpec((block_b, dim), lambda i: (i, 0)),
            pl.BlockSpec((dim, n_pad), lambda i: (0, 0)),
            pl.BlockSpec((1, n_pad), lambda i: (0, 0)),
        ],
        out_specs=pl.BlockSpec((block_b, n_pad), lambda i: (i, 0)),
        compiler_params=pltpu.CompilerParams(
            dimension_semantics=("parallel",)),
    )(psi_re, psi_im, m_pad, b_pad)

    return out[:, :num_class]


def classifier_forward(psi_re, psi_im, weight, bias, num_qubits):
    m_pad, b_pad = build_classifier_params(weight, bias, num_qubits)
    return classifier_apply(psi_re.astype(jnp.float32),
                            psi_im.astype(jnp.float32),
                            m_pad, b_pad, num_class=weight.shape[0])


def reference_forward(psi_re, psi_im, weight, bias, num_qubits):
    dim = psi_re.shape[-1]
    probs = psi_re ** 2 + psi_im ** 2
    k = jnp.arange(dim, dtype=jnp.int32)[:, None]
    shift = (num_qubits - 1 - jnp.arange(num_qubits, dtype=jnp.int32))[None, :]
    signs = (1.0 - 2.0 * ((k >> shift) & 1)).astype(jnp.float32)
    expvals = probs @ signs
    return expvals @ weight.T + bias[None, :]


if __name__ == "__main__":
    B = 8
    dim = 2 ** NUM_QUBITS

    key = jax.random.PRNGKey(0)
    k_re, k_im, k_w, k_b = jax.random.split(key, 4)

    # Random normalized state vector (real/imag parts), per batch element.
    psi_re = jax.random.normal(k_re, (B, dim), dtype=jnp.float32)
    psi_im = jax.random.normal(k_im, (B, dim), dtype=jnp.float32)
    norm = jnp.sqrt(jnp.sum(psi_re ** 2 + psi_im ** 2, axis=-1, keepdims=True))
    psi_re = psi_re / norm
    psi_im = psi_im / norm

    # Deterministic Linear(num_qubits, num_class) parameters (PyTorch-style
    # uniform(-1/sqrt(fan_in), 1/sqrt(fan_in)) init, but seeded here).
    bound = 1.0 / jnp.sqrt(jnp.float32(NUM_QUBITS))
    weight = jax.random.uniform(k_w, (NUM_CLASS, NUM_QUBITS),
                                minval=-bound, maxval=bound, dtype=jnp.float32)
    bias = jax.random.uniform(k_b, (NUM_CLASS,),
                              minval=-bound, maxval=bound, dtype=jnp.float32)

    out = classifier_forward(psi_re, psi_im, weight, bias, NUM_QUBITS)
    out = jax.block_until_ready(out)

    ref = reference_forward(psi_re, psi_im, weight, bias, NUM_QUBITS)
    assert out.shape == (B, NUM_CLASS)
    assert jnp.allclose(out, ref, atol=1e-5, rtol=1e-5)

    print("KERNEL_OK")
</pallas_src>

<mosaic_0001>
module attributes {stable_mosaic.version = 11 : i64} {
  func.func @classifier_kernel(%arg0: i32, %arg1: memref<8x64xf32, #tpu.memory_space<vmem>>, %arg2: memref<8x64xf32, #tpu.memory_space<vmem>>, %arg3: memref<64x16xf32, #tpu.memory_space<vmem>>, %arg4: memref<1x16xf32, #tpu.memory_space<vmem>>, %arg5: memref<8x16xf32, #tpu.memory_space<vmem>>) attributes {dimension_semantics = [#tpu.dimension_semantics<parallel>], iteration_bounds = array<i64: 1>, scalar_prefetch = 0 : i64, scratch_operands = 0 : i64, tpu.core_type = #tpu.core_type<tc>, window_params = [{transform_indices = @transform_0, window_bounds = array<i64: 8, 64>}, {transform_indices = @transform_1, window_bounds = array<i64: 8, 64>}, {pipeline_mode = #tpu.pipeline_mode<synchronous>, transform_indices = @transform_2, window_bounds = array<i64: 64, 16>}, {pipeline_mode = #tpu.pipeline_mode<synchronous>, transform_indices = @transform_3, window_bounds = array<i64: 1, 16>}, {transform_indices = @transform_4, window_bounds = array<i64: 8, 16>}]} {
    %c0 = arith.constant 0 : index
    %c0_0 = arith.constant 0 : index
    %0 = vector.load %arg1[%c0, %c0_0] : memref<8x64xf32, #tpu.memory_space<vmem>>, vector<8x64xf32>
    %c0_1 = arith.constant 0 : index
    %c0_2 = arith.constant 0 : index
    %1 = vector.load %arg2[%c0_1, %c0_2] : memref<8x64xf32, #tpu.memory_space<vmem>>, vector<8x64xf32>
    %2 = arith.mulf %0, %0 : vector<8x64xf32>
    %3 = arith.mulf %1, %1 : vector<8x64xf32>
    %4 = arith.addf %2, %3 : vector<8x64xf32>
    %c0_3 = arith.constant 0 : index
    %c0_4 = arith.constant 0 : index
    %5 = vector.load %arg3[%c0_3, %c0_4] : memref<64x16xf32, #tpu.memory_space<vmem>>, vector<64x16xf32>
    %cst = arith.constant dense<0.000000e+00> : vector<8x16xf32>
    %6 = tpu.matmul %4, %5, %cst {dimension_numbers = #tpu.dot_dimension_numbers<[1], [0], [0], [1], [0, 0, 1, 1], [], []>} : vector<8x64xf32>, vector<64x16xf32>, vector<8x16xf32> -> vector<8x16xf32>
    %c0_5 = arith.constant 0 : index
    %c0_6 = arith.constant 0 : index
    %7 = vector.load %arg4[%c0_5, %c0_6] : memref<1x16xf32, #tpu.memory_space<vmem>>, vector<1x16xf32>
    %8 = vector.broadcast %7 : vector<1x16xf32> to vector<8x16xf32>
    %9 = arith.addf %6, %8 : vector<8x16xf32>
    %c0_7 = arith.constant 0 : index
    %c0_8 = arith.constant 0 : index
    %10 = vector.load %arg5[%c0_7, %c0_8] : memref<8x16xf32, #tpu.memory_space<vmem>>, vector<8x16xf32>
    tpu.vector_store %arg5[%c0_7, %c0_8], %9 {strides = array<i32>} : memref<8x16xf32, #tpu.memory_space<vmem>>, vector<8x16xf32>,
    return
  }
  func.func @transform_0(%arg0: i32) -> (i32, i32) {
    %c0_i32 = arith.constant 0 : i32
    %c0_i32_0 = arith.constant 0 : i32
    return %arg0, %c0_i32 : i32, i32
  }
  func.func @transform_1(%arg0: i32) -> (i32, i32) {
    %c0_i32 = arith.constant 0 : i32
    %c0_i32_0 = arith.constant 0 : i32
    return %arg0, %c0_i32 : i32, i32
  }
  func.func @transform_2(%arg0: i32) -> (i32, i32) {
    %c0_i32 = arith.constant 0 : i32
    %c0_i32_0 = arith.constant 0 : i32
    %c0_i32_1 = arith.constant 0 : i32
    return %c0_i32, %c0_i32_0 : i32, i32
  }
  func.func @transform_3(%arg0: i32) -> (i32, i32) {
    %c0_i32 = arith.constant 0 : i32
    %c0_i32_0 = arith.constant 0 : i32
    %c0_i32_1 = arith.constant 0 : i32
    return %c0_i32, %c0_i32_0 : i32, i32
  }
  func.func @transform_4(%arg0: i32) -> (i32, i32) {
    %c0_i32 = arith.constant 0 : i32
    %c0_i32_0 = arith.constant 0 : i32
    return %arg0, %c0_i32 : i32, i32
  }
}

</mosaic_0001>

<bundles_post_ra>
// kernel: classifier_apply.1
= control target key start
LH: loop header
LB: loop body
LE: loop exit
PB: predicated region body
PF: predicated region fallthrough
CT: control target
= control target key end

     0   :  { %s168_s0 = inlined_call_operand.vmem [shape: f32[8,64], index: 0, kind: input, shape index: {}]   ;;  %s169_s1 = inlined_call_operand.vmem [shape: f32[8,64], index: 1, kind: input, shape index: {}]   ;;  %s170_s2 = inlined_call_operand.vmem [shape: f32[64,16], index: 2, kind: input, shape index: {}]   ;;  %s171_s3 = inlined_call_operand.vmem [shape: f32[1,16], index: 3, kind: input, shape index: {}]   ;;  %s172_s4 = inlined_call_operand.hbm [shape: f32[8,16], index: 4, kind: output, shape index: {}]  }
   0x1   :  { %v30_v0 = vld [vmem:[%s170_s2 + $0x38] sm:$0xff]  ;;  %v29_v1 = vld [vmem:[%s170_s2 + $0x30] sm:$0xff]  ;;  %v28_v2 = vld [vmem:[%s170_s2 + $0x28] sm:$0xff] }
   0x2   :  { %47 = vmatpush.msra.mxu0 %v30_v0  ;;  %v27_v3 = vld [vmem:[%s170_s2 + $0x20] sm:$0xff] }
   0x4   :  { %48 = vmatpush.msra.mxu0 %v29_v1 }
   0x5   :  { %9 = vsyncpa [#allocation3], 0  ;;  %v18_v4 = vld [vmem:[%s168_s0] sm:$0xff]  ;;  %v26_v6 = vld [vmem:[%s170_s2 + $0x18] sm:$0xff]  ;;  %vm35_vm0 = vcmask 523264   ;;  %s106_s9 = smov [#allocation2]  }
   0x6   :  { %49 = vmatpush.msra.mxu0 %v28_v2  ;;  %v19_v5 = vld [vmem:[%s169_s1] sm:$0xff]  ;;  %v25_v7 = vld [vmem:[%s170_s2 + $0x10] sm:$0xff]  ;;  %v20_v8 = vmul.f32 %v18_v4, %v18_v4  ;;  %v24_v10 = vld [vmem:[%s170_s2 + $0x8] sm:$0xff]  ;;  %s66_s10 = sshll.u32 %s106_s9, 4  ;;  %s68_s13 = sshll.u32 %s172_s4, 4  ;;  %vm59_vm1 = vcmask 130048   ;;  %s67_s10 = int_to_ptr.vmem [resolvable:$true] %s66_s10  ;;  %s69_s13 = int_to_ptr.hbm [resolvable:$true] %s68_s13 }
   0x7   :  { %v21_v9 = vmul.f32 %v19_v5, %v19_v5  ;;  %v23_v11 = vld [vmem:[%s170_s2] sm:$0xff] }
   0x8   :  { %50 = vmatpush.msra.mxu0 %v27_v3  ;;  %v79_v13 = vld [vmem:[%s171_s3] ss:$0 sm:$0xff] }
   0x9   :  { %v22_v12 = vadd.f32 %v21_v9, %v20_v8 }
   0xa   :  { %51 = vmatpush.msra.mxu0 %v26_v6 }
   0xc   :  { %52 = vmatpush.msra.mxu0 %v25_v7 }
   0xe   :  { %53 = vmatpush.msra.mxu0 %v24_v10 }
  0x10   :  { %54 = vmatpush.msra.mxu0 %v23_v11 }
  0x11   :  { %77 = vmatmul.msk.f32.vlgmr.msra.gmra.mxu0 %vm35_vm0, %v22_v12 }
  0x8e   :  { %v56_v14 = vpop.f32.mrf.mxu0 }
  0x8f   :  { %v57_v15 = vadd.f32 %v79_v13, %v56_v14 }
  0x91   :  { %60 = vst.msk [vmem:[#allocation2] sm:$0xff] %vm59_vm1, %v57_v15 }
  0x92   :  { %71 = dma.vmem_to_hbm [thread:$0]  %s67_s10, 128, %s69_s13, [#allocation3]  }
  0x93   :  { %104 = dma.done.wait [#allocation3], 128  }
  0x94   :  { %105 = vsyncadd [#allocation3], 4294967168 }
  0x95   :  { %76 = vsyncpa [#allocation3], 1 }

</bundles_post_ra>
